<compile_context>
chip_gen: v7x
topology: tpu7x:2x2x1
jax: 0.10.0
libtpu: 0.0.40
codegen_flags: <defaults>
</compile_context>

<pallas_src>
import functools

import jax
import jax.numpy as jnp
from jax.experimental import pallas as pl
from jax.experimental.pallas import tpu as pltpu

FACTOR_NUM = 84  # matches the module default


def _round_up(x, m):
    return (x + m - 1) // m * m


def _pairfm_kernel(user_ref, itemi_ref, itemj_ref, bias2_ref, out_ref):
    # user/itemi/itemj : VMEM (tb, F) f32 gathered embedding rows
    # bias2            : VMEM (tb, 2) [u_bias+i_bias[i]+bias_, u_bias+i_bias[j]+bias_]
    # out              : VMEM (tb, 2) [pred_i, pred_j]
    user = user_ref[...]

    # Element-wise products in f32 on the VPU; round to bf16 only for the MXU
    # reduction (guarantees a single-pass matmul, accumulation stays f32).
    prod_i = (user * itemi_ref[...]).astype(jnp.bfloat16)            # (tb, F)
    prod_j = (user * itemj_ref[...]).astype(jnp.bfloat16)            # (tb, F)

    f = user.shape[-1]
    col = jax.lax.broadcasted_iota(jnp.int32, (f, 2), 1)
    sel_i = jnp.where(col == 0, 1.0, 0.0).astype(jnp.bfloat16)       # ones in column 0
    sel_j = jnp.where(col == 0, 0.0, 1.0).astype(jnp.bfloat16)       # ones in column 1

    # Factor-axis reduction on the MXU (ones-selector matmul) instead of a cross-lane
    # XLU reduce: column 0 = sum(prod_i, -1), column 1 = sum(prod_j, -1).
    pred = (jnp.dot(prod_i, sel_i, preferred_element_type=jnp.float32)
            + jnp.dot(prod_j, sel_j, preferred_element_type=jnp.float32))   # (tb, 2)

    # Single full-block store.
    out_ref[...] = pred + bias2_ref[...]


@functools.partial(jax.jit, static_argnames=("tb",))
def pairfm_forward(params, u, i, j, *, tb=4096):
    """Pallas implementation of PairFMV2.forward."""
    embed_user, embed_item, u_bias, i_bias, bias_ = params
    B = u.shape[0]
    F = embed_user.shape[1]

    u = jnp.asarray(u, jnp.int32)
    i = jnp.asarray(i, jnp.int32)
    j = jnp.asarray(j, jnp.int32)

    # --- tile / grid selection -------------------------------------------------
    b8 = _round_up(B, 8)
    tb_req = max(8, min(_round_up(tb, 8), b8, 8192))
    num_steps = -(-b8 // tb_req)            # ceil
    if b8 >= 2048:
        # Keep >= 2 grid steps for medium/large batches so the "parallel" batch axis
        # gives work to both TensorCores on v7x.
        num_steps = max(num_steps, 2)
    tb_eff = _round_up(-(-b8 // num_steps), 8)   # balanced tiles, minimal padding
    Bp = tb_eff * num_steps
    pad = Bp - B
    if pad:
        # Padding with index 0 is safe: padded rows are sliced off below.
        u = jnp.pad(u, (0, pad))
        i = jnp.pad(i, (0, pad))
        j = jnp.pad(j, (0, pad))

    # --- gathers (XLA glue; see header + TODO) ---------------------------------
    user   = jnp.take(embed_user, u, axis=0).astype(jnp.float32)     # [Bp, F]
    item_i = jnp.take(embed_item, i, axis=0).astype(jnp.float32)     # [Bp, F]
    item_j = jnp.take(embed_item, j, axis=0).astype(jnp.float32)     # [Bp, F]
    ub = jnp.take(u_bias, u, axis=0)                                  # [Bp, 1]
    bias2 = jnp.concatenate(
        [ub + jnp.take(i_bias, i, axis=0),
         ub + jnp.take(i_bias, j, axis=0)], axis=1)
    bias2 = (bias2 + bias_.reshape(1, 1)).astype(jnp.float32)         # [Bp, 2]

    vec_spec = pl.BlockSpec((tb_eff, F), lambda b: (b, 0))
    two_spec = pl.BlockSpec((tb_eff, 2), lambda b: (b, 0))

    # True per-step VMEM footprint: every block's lane dim pads to 128 in VMEM even
    # though the DMA only moves F=84 / 2 real lanes.
    per_step_vmem = tb_eff * 4 * (3 * _round_up(F, 128) + 2 * 128)
    vmem_limit = int(2.5 * per_step_vmem) + (4 << 20)    # ~2.5x + headroom, no 32MiB floor

    # Advisory cost: kernel I/O plus the embedding/bias table reads feeding this call,
    # so XLA schedules neighbouring ops sensibly around the custom call.
    flops = Bp * (10 * F + 2)
    bytes_accessed = Bp * (3 * F + 4) * 4 + B * (3 * F + 3) * 4
    cost = pl.CostEstimate(flops=flops, transcendentals=0, bytes_accessed=bytes_accessed)

    pred = pl.pallas_call(
        _pairfm_kernel,
        out_shape=jax.ShapeDtypeStruct((Bp, 2), jnp.float32),
        grid=(num_steps,),
        in_specs=[vec_spec, vec_spec, vec_spec, two_spec],
        out_specs=two_spec,
        compiler_params=pltpu.CompilerParams(
            dimension_semantics=("parallel",),
            vmem_limit_bytes=vmem_limit),
        cost_estimate=cost,
    )(user, item_i, item_j, bias2)

    # mirrors pred_i.view(-1), pred_j.view(-1)
    return pred[:B, 0], pred[:B, 1]


def init_params(key, user_num, item_num, factor_num=FACTOR_NUM):
    """Init mirroring the PyTorch __init__ (normal std=0.01 embeddings, zero biases)."""
    k_u, k_i = jax.random.split(key)
    embed_user = 0.01 * jax.random.normal(k_u, (user_num, factor_num), jnp.float32)
    embed_item = 0.01 * jax.random.normal(k_i, (item_num, factor_num), jnp.float32)
    u_bias = jnp.zeros((user_num, 1), jnp.float32)
    i_bias = jnp.zeros((item_num, 1), jnp.float32)
    bias_ = jnp.zeros((1,), jnp.float32)
    return (embed_user, embed_item, u_bias, i_bias, bias_)


def random_params(key, user_num, item_num, factor_num=FACTOR_NUM):
    """Like init_params but with non-zero biases so the bias path is exercised."""
    k = jax.random.split(key, 5)
    return (0.01 * jax.random.normal(k[0], (user_num, factor_num), jnp.float32),
            0.01 * jax.random.normal(k[1], (item_num, factor_num), jnp.float32),
            0.01 * jax.random.normal(k[2], (user_num, 1), jnp.float32),
            0.01 * jax.random.normal(k[3], (item_num, 1), jnp.float32),
            0.01 * jax.random.normal(k[4], (1,), jnp.float32))


def _reference_forward(params, u, i, j):
    embed_user, embed_item, u_bias, i_bias, bias_ = params
    user, item_i, item_j = embed_user[u], embed_item[i], embed_item[j]
    pred_i = jnp.sum(user * item_i, -1, keepdims=True) + u_bias[u] + i_bias[i] + bias_
    pred_j = jnp.sum(user * item_j, -1, keepdims=True) + u_bias[u] + i_bias[j] + bias_
    return pred_i.reshape(-1), pred_j.reshape(-1)


def _check(got, ref, atol=5e-5, rtol=1e-3):
    gi, gj = got
    ri, rj = ref
    assert gi.shape == ri.shape and gj.shape == rj.shape
    assert jnp.allclose(gi, ri, atol=atol, rtol=rtol), float(jnp.max(jnp.abs(gi - ri)))
    assert jnp.allclose(gj, rj, atol=atol, rtol=rtol), float(jnp.max(jnp.abs(gj - rj)))


if __name__ == "__main__":
    key = jax.random.PRNGKey(0)
    k_param, k_param2, k_u, k_i, k_j = jax.random.split(key, 5)

    USER_NUM, ITEM_NUM, B = 64, 128, 16
    params = init_params(k_param, USER_NUM, ITEM_NUM, FACTOR_NUM)

    u = jax.random.randint(k_u, (B,), 0, USER_NUM, dtype=jnp.int32)
    i = jax.random.randint(k_i, (B,), 0, ITEM_NUM, dtype=jnp.int32)
    j = jax.random.randint(k_j, (B,), 0, ITEM_NUM, dtype=jnp.int32)

    # 1) Default path: small batch, tile clamps to the batch, single grid step.
    out = pairfm_forward(params, u, i, j)
    jax.block_until_ready(out)
    _check(out, _reference_forward(params, u, i, j))

    # 2) Multi-step grid path (tb=8 -> 2 grid steps).
    out = pairfm_forward(params, u, i, j, tb=8)
    jax.block_until_ready(out)
    _check(out, _reference_forward(params, u, i, j))

    # 3) Ragged batch (B not a multiple of the tile -> padding + slice).
    B2 = 12
    u2, i2, j2 = u[:B2], i[:B2], j[:B2]
    out = pairfm_forward(params, u2, i2, j2, tb=8)
    jax.block_until_ready(out)
    _check(out, _reference_forward(params, u2, i2, j2))

    # 4) Larger batch with non-zero biases: exercises the bias path and the
    #    ">= 2 grid steps" split that keeps both v7x TensorCores busy.
    B3 = 2048
    params_r = random_params(k_param2, USER_NUM, ITEM_NUM, FACTOR_NUM)
    k_u3, k_i3, k_j3 = jax.random.split(jax.random.PRNGKey(1), 3)
    u3 = jax.random.randint(k_u3, (B3,), 0, USER_NUM, dtype=jnp.int32)
    i3 = jax.random.randint(k_i3, (B3,), 0, ITEM_NUM, dtype=jnp.int32)
    j3 = jax.random.randint(k_j3, (B3,), 0, ITEM_NUM, dtype=jnp.int32)
    out = pairfm_forward(params_r, u3, i3, j3)
    jax.block_until_ready(out)
    _check(out, _reference_forward(params_r, u3, i3, j3))

    print("KERNEL_OK")
</pallas_src>

<mosaic_0001>
module attributes {stable_mosaic.version = 11 : i64} {
  func.func @_pairfm_kernel(%arg0: i32, %arg1: memref<16x84xf32, #tpu.memory_space<vmem>>, %arg2: memref<16x84xf32, #tpu.memory_space<vmem>>, %arg3: memref<16x84xf32, #tpu.memory_space<vmem>>, %arg4: memref<16x2xf32, #tpu.memory_space<vmem>>, %arg5: memref<16x2xf32, #tpu.memory_space<vmem>>) attributes {dimension_semantics = [#tpu.dimension_semantics<parallel>], iteration_bounds = array<i64: 1>, scalar_prefetch = 0 : i64, scratch_operands = 0 : i64, tpu.core_type = #tpu.core_type<tc>, window_params = [{transform_indices = @transform_0, window_bounds = array<i64: 16, 84>}, {transform_indices = @transform_1, window_bounds = array<i64: 16, 84>}, {transform_indices = @transform_2, window_bounds = array<i64: 16, 84>}, {transform_indices = @transform_3, window_bounds = array<i64: 16, 2>}, {transform_indices = @transform_4, window_bounds = array<i64: 16, 2>}]} {
    %c0 = arith.constant 0 : index
    %c0_0 = arith.constant 0 : index
    %0 = vector.load %arg1[%c0, %c0_0] : memref<16x84xf32, #tpu.memory_space<vmem>>, vector<16x84xf32>
    %c0_1 = arith.constant 0 : index
    %c0_2 = arith.constant 0 : index
    %1 = vector.load %arg2[%c0_1, %c0_2] : memref<16x84xf32, #tpu.memory_space<vmem>>, vector<16x84xf32>
    %2 = arith.mulf %0, %1 : vector<16x84xf32>
    %3 = arith.truncf %2 : vector<16x84xf32> to vector<16x84xbf16>
    %c0_3 = arith.constant 0 : index
    %c0_4 = arith.constant 0 : index
    %4 = vector.load %arg3[%c0_3, %c0_4] : memref<16x84xf32, #tpu.memory_space<vmem>>, vector<16x84xf32>
    %5 = arith.mulf %0, %4 : vector<16x84xf32>
    %6 = arith.truncf %5 : vector<16x84xf32> to vector<16x84xbf16>
    %7 = tpu.iota {dimensions = array<i32: 1>} : vector<84x2xi32>
    %c0_i32 = arith.constant 0 : i32
    %8 = vector.broadcast %c0_i32 : i32 to vector<84x2xi32>
    %9 = arith.cmpi eq, %7, %8 : vector<84x2xi32>
    %cst = arith.constant 1.000000e+00 : f32
    %cst_5 = arith.constant 0.000000e+00 : f32
    %10 = vector.broadcast %cst : f32 to vector<84x2xf32>
    %11 = vector.broadcast %cst_5 : f32 to vector<84x2xf32>
    %12 = arith.select %9, %10, %11 : vector<84x2xi1>, vector<84x2xf32>
    %13 = arith.truncf %12 : vector<84x2xf32> to vector<84x2xbf16>
    %c0_i32_6 = arith.constant 0 : i32
    %14 = vector.broadcast %c0_i32_6 : i32 to vector<84x2xi32>
    %15 = arith.cmpi eq, %7, %14 : vector<84x2xi32>
    %cst_7 = arith.constant 0.000000e+00 : f32
    %cst_8 = arith.constant 1.000000e+00 : f32
    %16 = vector.broadcast %cst_7 : f32 to vector<84x2xf32>
    %17 = vector.broadcast %cst_8 : f32 to vector<84x2xf32>
    %18 = arith.select %15, %16, %17 : vector<84x2xi1>, vector<84x2xf32>
    %19 = arith.truncf %18 : vector<84x2xf32> to vector<84x2xbf16>
    %cst_9 = arith.constant dense<0.000000e+00> : vector<16x2xf32>
    %20 = tpu.matmul %3, %13, %cst_9 {dimension_numbers = #tpu.dot_dimension_numbers<[1], [0], [0], [1], [0, 0, 1, 1], [], []>} : vector<16x84xbf16>, vector<84x2xbf16>, vector<16x2xf32> -> vector<16x2xf32>
    %cst_10 = arith.constant dense<0.000000e+00> : vector<16x2xf32>
    %21 = tpu.matmul %6, %19, %cst_10 {dimension_numbers = #tpu.dot_dimension_numbers<[1], [0], [0], [1], [0, 0, 1, 1], [], []>} : vector<16x84xbf16>, vector<84x2xbf16>, vector<16x2xf32> -> vector<16x2xf32>
    %22 = arith.addf %20, %21 : vector<16x2xf32>
    %c0_11 = arith.constant 0 : index
    %c0_12 = arith.constant 0 : index
    %23 = vector.load %arg4[%c0_11, %c0_12] : memref<16x2xf32, #tpu.memory_space<vmem>>, vector<16x2xf32>
    %24 = arith.addf %22, %23 : vector<16x2xf32>
    %c0_13 = arith.constant 0 : index
    %c0_14 = arith.constant 0 : index
    %25 = vector.load %arg5[%c0_13, %c0_14] : memref<16x2xf32, #tpu.memory_space<vmem>>, vector<16x2xf32>
    tpu.vector_store %arg5[%c0_13, %c0_14], %24 {strides = array<i32>} : memref<16x2xf32, #tpu.memory_space<vmem>>, vector<16x2xf32>,
    return
  }
  func.func @transform_0(%arg0: i32) -> (i32, i32) {
    %c0_i32 = arith.constant 0 : i32
    %c0_i32_0 = arith.constant 0 : i32
    return %arg0, %c0_i32 : i32, i32
  }
  func.func @transform_1(%arg0: i32) -> (i32, i32) {
    %c0_i32 = arith.constant 0 : i32
    %c0_i32_0 = arith.constant 0 : i32
    return %arg0, %c0_i32 : i32, i32
  }
  func.func @transform_2(%arg0: i32) -> (i32, i32) {
    %c0_i32 = arith.constant 0 : i32
    %c0_i32_0 = arith.constant 0 : i32
    return %arg0, %c0_i32 : i32, i32
  }
  func.func @transform_3(%arg0: i32) -> (i32, i32) {
    %c0_i32 = arith.constant 0 : i32
    %c0_i32_0 = arith.constant 0 : i32
    return %arg0, %c0_i32 : i32, i32
  }
  func.func @transform_4(%arg0: i32) -> (i32, i32) {
    %c0_i32 = arith.constant 0 : i32
    %c0_i32_0 = arith.constant 0 : i32
    return %arg0, %c0_i32 : i32, i32
  }
}

</mosaic_0001>

<bundles_post_ra>
// kernel: pairfm_forward.1
= control target key start
LH: loop header
LB: loop body
LE: loop exit
PB: predicated region body
PF: predicated region fallthrough
CT: control target
= control target key end

     0   :  { %v30_v0 = vlaneseq  ;;  %v226_v1 = vmov 0.0   ;;  %vm227_vm0 = vmmov 0   ;;  %v228_v4 = vmov 1.0|1.0   ;;  %s318_s0 = inlined_call_operand.vmem [shape: f32[16,84], index: 0, kind: input, shape index: {}]   ;;  %s319_s1 = inlined_call_operand.vmem [shape: f32[16,84], index: 1, kind: input, shape index: {}]   ;;  %s320_s2 = inlined_call_operand.vmem [shape: f32[16,84], index: 2, kind: input, shape index: {}]   ;;  %s321_s3 = inlined_call_operand.vmem [shape: f32[16,2], index: 3, kind: input, shape index: {}]   ;;  %s322_s4 = inlined_call_operand.vmem [shape: f32[16,2], index: 4, kind: output, shape index: {}]  }
   0x1   :  { %206 = vmatprep.subr.bf16.mxu1 %v226_v1  ;;  %190 = vmatprep.subr.bf16.mxu0 %v226_v1  ;;  %v18_v7 = vld [vmem:[%s318_s0] sm:$0xff]  ;;  %v229_v8 = vmov 1.0   ;;  %v19_v10 = vld [vmem:[%s318_s0 + $0x8] sm:$0xff]  ;;  %vm41_vm5 = vcmask 1041408   ;;  %vm37_vm6 = vcmask 687104   ;;  %vm137_vm7 = vcmask 15360  }
   0x2   :  { %v31_v2 = vand.u32 127, %v30_v0  ;;  %218 = vmatprep.mubr.msk.bf16.mxu1 %vm227_vm0, %v226_v1  ;;  %202 = vmatprep.mubr.msk.bf16.mxu0 %vm227_vm0, %v226_v1  ;;  %v20_v11 = vld [vmem:[%s319_s1] sm:$0xff]  ;;  %v21_v12 = vld [vmem:[%s319_s1 + $0x8] sm:$0xff] }
   0x3   :  { %v25_v14 = vld [vmem:[%s320_s2] sm:$0xff]  ;;  %v26_v15 = vld [vmem:[%s320_s2 + $0x8] sm:$0xff]  ;;  %v22_v17 = vmul.f32 %v20_v11, %v18_v7  ;;  %v23_v18 = vmul.f32 %v21_v12, %v19_v10 }
   0x4   :  { %vm32_vm1 = vcmp.eq.s32.totalorder %v31_v2, 0  ;;  %v27_v20 = vmul.f32 %v25_v14, %v18_v7  ;;  %v28_v21 = vmul.f32 %v26_v15, %v19_v10  ;;  %v133_v28 = vld [vmem:[%s321_s3] sm:$0xff]  ;;  %v134_v34 = vld [vmem:[%s321_s3 + $0x8] sm:$0xff] }
   0x5   :  { %vm257_vm2 = vmpackc.low %vm32_vm1, %vm32_vm1  ;;  %v33_v6 = vsel %vm32_vm1, 1.0, %v226_v1  ;;  %v35_v9 = vsel %vm32_vm1, 0.0, %v229_v8  ;;  %v24_v23 = vpack.c.bf16 %v23_v18, %v22_v17 }
   0x6   :  { %207 = vmatpush3.bf16.msk.msra.mxu1 %vm257_vm2, %v228_v4  ;;  %vm144_vm3 = vmneg %vm32_vm1  ;;  %v34_v13 = vpack.c.bf16 %v33_v6, %v33_v6  ;;  %v36_v16 = vpack.c.bf16 %v35_v9, %v35_v9  ;;  %v29_v24 = vpack.c.bf16 %v28_v21, %v27_v20 }
   0x7   :  { %vm264_vm4 = vmpackc.low %vm144_vm3, %vm144_vm3  ;;  %208 = vmatprep.subr.bf16.mxu1 %v226_v1 }
   0x8   :  { %191 = vmatpush3.bf16.msk.msra.mxu0 %vm264_vm4, %v228_v4  ;;  %v90_v19 = vsel %vm41_vm5, %v34_v13, 0  ;;  %v43_v22 = vsel %vm41_vm5, %v36_v16, 0 }
   0x9   :  { %192 = vmatprep.subr.bf16.mxu0 %v226_v1 }
   0xa   :  { %209 = vmatpush3.bf16.msk.msra.mxu1 %vm257_vm2, %v228_v4 }
   0xb   :  { %210 = vmatprep.subr.bf16.mxu1 %v226_v1 }
   0xc   :  { %193 = vmatpush3.bf16.msk.msra.mxu0 %vm264_vm4, %v228_v4 }
   0xd   :  { %194 = vmatprep.subr.bf16.mxu0 %v226_v1 }
   0xe   :  { %211 = vmatpush3.bf16.msk.msra.mxu1 %vm257_vm2, %v228_v4 }
   0xf   :  { %212 = vmatprep.subr.bf16.mxu1 %v226_v1 }
  0x10   :  { %195 = vmatpush3.bf16.msk.msra.mxu0 %vm264_vm4, %v228_v4 }
  0x11   :  { %196 = vmatprep.subr.bf16.mxu0 %v226_v1 }
  0x12   :  { %213 = vmatpush3.bf16.msk.msra.mxu1 %vm257_vm2, %v228_v4 }
  0x13   :  { %214 = vmatprep.subr.bf16.mxu1 %v226_v1 }
  0x14   :  { %197 = vmatpush3.bf16.msk.msra.mxu0 %vm264_vm4, %v228_v4 }
  0x15   :  { %198 = vmatprep.subr.bf16.mxu0 %v226_v1 }
  0x16   :  { %215 = vmatpush3.bf16.msk.msra.mxu1 %vm257_vm2, %v228_v4 }
  0x17   :  { %216 = vmatprep.subr.bf16.mxu1 %v226_v1 }
  0x18   :  { %199 = vmatpush3.bf16.msk.msra.mxu0 %vm264_vm4, %v228_v4 }
  0x19   :  { %200 = vmatprep.subr.bf16.mxu0 %v226_v1 }
  0x1a   :  { %217 = vmatpush3.bf16.msra.mxu1 %v90_v19 }
  0x1c   :  { %201 = vmatpush3.bf16.msra.mxu0 %v43_v22 }
  0x1d   :  { %219 = vmatmul.mubr.msk.bf16.vlgmr.msra.gmra.mrb[0].mxu1 %vm37_vm6, %v24_v23 }
  0x1f   :  { %203 = vmatmul.mubr.msk.bf16.vlgmr.msra.gmra.mrb[0].mxu0 %vm37_vm6, %v29_v24 }
  0xf0   :  { %v126_v25 = vpop.f32.mrb[0].mxu1 }
  0xf1   :  { %v220_v26 = vpop.f32.mrb[1].mxu1 }
  0xf2   :  { %v79_v27 = vpop.f32.mrb[0].mxu0  ;;  %v129_v29 = vpop.f32.mrb[2].mxu1 }
  0xf3   :  { %v127_v30 = vadd.f32 %v126_v25, %v79_v27  ;;  %v204_v31 = vpop.f32.mrb[1].mxu0  ;;  %v221_v32 = vpop.f32.mrb[3].mxu1 }
  0xf4   :  { %v82_v33 = vpop.f32.mrb[2].mxu0 }
  0xf5   :  { %v135_v35 = vadd.f32 %v133_v28, %v127_v30  ;;  %v130_v36 = vadd.f32 %v129_v29, %v82_v33  ;;  %v205_v37 = vpop.f32.mrb[3].mxu0 }
  0xf7   :  { %138 = vst.msk [vmem:[%s322_s4] sm:$0xff] %vm137_vm7, %v135_v35  ;;  %v136_v38 = vadd.f32 %v134_v34, %v130_v36 }
  0xf9   :  { %139 = vst.msk [vmem:[%s322_s4 + $0x8] sm:$0xff] %vm137_vm7, %v136_v38 }

</bundles_post_ra>
